<compile_context>
chip_gen: v7x
topology: tpu7x:2x2x1
jax: 0.10.0
libtpu: 0.0.40
codegen_flags: <defaults>
</compile_context>

<pallas_src>
import jax
import jax.numpy as jnp
from jax import lax
from jax.experimental import pallas as pl
from jax.experimental.pallas import tpu as pltpu  # noqa: F401  (TPU backend)

# Small shapes consistent with the module: batch=2, tokens=8, d_model=32,
# nhead=4, dim_feedforward=64.
B, N, E, H, F = 2, 8, 32, 4, 64
DH = E // H
BN = B * N
EPS = 1e-5
NEG_INF = -1e30
LW = 2 * E + H * E                 # packed-weight lane width = 192
N_SHIFT = N.bit_length() - 1       # in-kernel mask uses a shift (N power of 2)
assert (1 << N_SHIFT) == N


def _layernorm(x, g, b):
    """One-pass LN statistics: independent sum / sum-of-squares reductions."""
    inv_n = 1.0 / x.shape[-1]
    s1 = jnp.sum(x, axis=-1, keepdims=True)
    s2 = jnp.sum(x * x, axis=-1, keepdims=True)
    mu = s1 * inv_n
    var = s2 * inv_n - mu * mu
    return (x - mu) * lax.rsqrt(var + EPS) * g + b


def _gelu_exact(x):
    """Exact (erf-based) GELU matching F.gelu.  erf via Abramowitz-Stegun
    7.1.26 (|abs err| < 1.5e-7); the divide runs on the EUP (approx recip)."""
    z = x * 0.7071067811865476
    sign = jnp.where(z >= 0.0, 1.0, -1.0)
    az = jnp.abs(z)
    t = pl.reciprocal(1.0 + 0.3275911 * az, approx=True)
    poly = t * (0.254829592 + t * (-0.284496736 + t * (1.421413741
                + t * (-1.453152027 + t * 1.061405429))))
    erf = sign * (1.0 - poly * jnp.exp(-az * az))
    return 0.5 * x * (1.0 + erf)


def video_encoder_layer_kernel(x_ref, wbuf_ref, o_ref):
    """Single invocation; everything VMEM resident.
       x_ref    : (B*N, E)    tokens (batch flattened into rows)
       wbuf_ref : (136, 192)  packed params, rows:
                   [  0: 32]  W_all = [Wq*scale | Wk | Wvp_h0..Wvp_h3]  (32,192)
                   [ 32: 64]  W1   (E,F) FFN in,  lanes [0:F)
                   [ 64:128]  W2   (F,E) FFN out, lanes [0:E)
                   [128:136]  vec  = [g_pre,b_pre,b_proj,g1,be1,b2,b1,0] (8,F)
    """
    x = x_ref[...]

    w_all = wbuf_ref[0:E, :]                       # (32, 192)
    w1 = wbuf_ref[E:2 * E, 0:F]                    # (32, 64)
    w2 = wbuf_ref[2 * E:2 * E + F, 0:E]            # (64, 32)
    vec = wbuf_ref[2 * E + F:2 * E + F + 8, 0:F]   # (8, 64)
    g_pre, be_pre = vec[0:1, :E], vec[1:2, :E]
    b_proj = vec[2:3, :E]
    g1, be1 = vec[3:4, :E], vec[4:5, :E]
    b2 = vec[5:6, :E]
    b1 = vec[6:7, :]

    # ---- block-diagonal batch mask, generated in-kernel (no DMA operand) ----
    rb = lax.broadcasted_iota(jnp.int32, (BN, BN), 0) >> N_SHIFT
    cb = lax.broadcasted_iota(jnp.int32, (BN, BN), 1) >> N_SHIFT
    mask = jnp.where(rb == cb, 0.0, NEG_INF).astype(jnp.float32)

    # ---- pre-norm ----
    y = _layernorm(x, g_pre, be_pre)

    # ---- attention: ONE fused projection push, then per-head lane slices ----
    big = jnp.dot(y, w_all, preferred_element_type=jnp.float32)    # (BN, 192)

    attn = jnp.zeros((BN, E), jnp.float32)
    for h in range(H):                                              # H=4, unrolled
        qh = big[:, h * DH:(h + 1) * DH]                            # (BN, DH), scale folded
        kh = big[:, E + h * DH:E + (h + 1) * DH]                    # (BN, DH)
        vproj_h = big[:, 2 * E + h * E:2 * E + (h + 1) * E]         # (BN, E) = y @ (Wv_h @ Wproj_h)
        # q @ k^T without materializing a transpose (contract last dims).
        s = lax.dot_general(qh, kh, (((1,), (1,)), ((), ())),
                            preferred_element_type=jnp.float32) + mask
        s = s - jnp.max(s, axis=-1, keepdims=True)
        p = jnp.exp(s)
        p = p * pl.reciprocal(jnp.sum(p, axis=-1, keepdims=True), approx=True)
        attn = attn + jnp.dot(p, vproj_h, preferred_element_type=jnp.float32)
    attn = attn + b_proj

    # ---- residual + norm1 ----
    r = _layernorm(x + attn, g1, be1)

    # ---- FFN (exact GELU), dropouts identity, second residual, no final norm ----
    hdn = _gelu_exact(jnp.dot(r, w1, preferred_element_type=jnp.float32) + b1)
    ffn = jnp.dot(hdn, w2, preferred_element_type=jnp.float32) + b2
    o_ref[...] = r + ffn


@jax.jit
def video_transformer_encoder_layer(src, wbuf):
    """src: (B, N, E) batch-first, as the PyTorch module expects."""
    x2d = src.astype(jnp.float32).reshape(BN, E)    # contiguous reshape (free)
    out = pl.pallas_call(
        video_encoder_layer_kernel,
        out_shape=jax.ShapeDtypeStruct((BN, E), jnp.float32),
    )(x2d, wbuf)
    return out.reshape(B, N, E)


# ----------------------------- parameters ---------------------------------- #
def init_params(key):
    """PyTorch-layout parameters (deterministic uniform fan-in init)."""
    ks = jax.random.split(key, 7)

    def u(k, shape, fan_in):
        bound = 1.0 / (fan_in ** 0.5)
        return jax.random.uniform(k, shape, jnp.float32, -bound, bound)

    wqkv = u(ks[0], (3 * E, E), E)          # qkv Linear (bias=False)
    wproj = u(ks[1], (E, E), E)
    bproj = u(ks[2], (E,), E)
    w1 = u(ks[3], (F, E), E)
    b1 = u(ks[4], (F,), E)
    w2 = u(ks[5], (E, F), F)
    b2 = u(ks[6], (E,), F)
    g_pre = jnp.ones((E,), jnp.float32)
    be_pre = jnp.zeros((E,), jnp.float32)
    g1 = jnp.ones((E,), jnp.float32)
    be1 = jnp.zeros((E,), jnp.float32)
    return (wqkv, wproj, bproj, w1, b1, w2, b2, g_pre, be_pre, g1, be1)


def prepare_kernel_params(params):
    """Host-side layout work: transpose, fold scale & Wproj, pack everything
    into ONE contiguous fp32 buffer (2 pallas_call operands total)."""
    (wqkv, wproj, bproj, w1, b1, w2, b2, g_pre, be_pre, g1, be1) = params
    scale = DH ** -0.5
    wq_t = wqkv[0:E, :].T * scale           # (in, out), 1/sqrt(dh) folded in
    wk_t = wqkv[E:2 * E, :].T
    wv_t = wqkv[2 * E:, :].T
    wproj_t = wproj.T                       # (in, out)

    # Fold the output projection into V per head: Wvp_h = Wv_h @ Wproj_rows_h.
    vproj_blocks = []
    for h in range(H):
        wv_h = wv_t[:, h * DH:(h + 1) * DH]          # (E, DH)
        wp_h = wproj_t[h * DH:(h + 1) * DH, :]       # (DH, E)
        vproj_blocks.append(wv_h @ wp_h)             # (E, E)

    w_all = jnp.concatenate([wq_t, wk_t] + vproj_blocks, axis=1)    # (E, 192)
    w1_t = w1.T                                                      # (E, F)
    w2_t = w2.T                                                      # (F, E)

    def pad_f(v):
        return jnp.pad(v, (0, F - v.shape[0]))

    vec_pack = jnp.stack([pad_f(g_pre), pad_f(be_pre), pad_f(bproj),
                          pad_f(g1), pad_f(be1), pad_f(b2),
                          b1, jnp.zeros((F,), jnp.float32)], axis=0)  # (8, F)

    def pad_lanes(m):
        return jnp.pad(m, ((0, 0), (0, LW - m.shape[1])))

    wbuf = jnp.concatenate([w_all,
                            pad_lanes(w1_t),
                            pad_lanes(w2_t),
                            pad_lanes(vec_pack)], axis=0)            # (136, 192)
    return wbuf


# ------------------------------ reference ----------------------------------- #
def reference(src, params):
    """Pure-JAX reference of the PyTorch forward (eval mode)."""
    (wqkv, wproj, bproj, w1, b1, w2, b2, g_pre, be_pre, g1, be1) = params
    x = src.astype(jnp.float32)

    def ln(t, g, b):
        mu = t.mean(-1, keepdims=True)
        var = ((t - mu) ** 2).mean(-1, keepdims=True)
        return (t - mu) / jnp.sqrt(var + EPS) * g + b

    y = ln(x, g_pre, be_pre)
    qkv = jnp.einsum('bne,fe->bnf', y, wqkv)
    q, k, v = qkv[..., :E], qkv[..., E:2 * E], qkv[..., 2 * E:]

    def heads(t):
        return t.reshape(B, N, H, DH).transpose(0, 2, 1, 3)

    qh, kh, vh = heads(q) * (DH ** -0.5), heads(k), heads(v)
    s = jnp.einsum('bhnd,bhmd->bhnm', qh, kh)
    p = jax.nn.softmax(s, axis=-1)
    a = jnp.einsum('bhnm,bhmd->bhnd', p, vh).transpose(0, 2, 1, 3).reshape(B, N, E)
    a = jnp.einsum('bne,fe->bnf', a, wproj) + bproj

    r = ln(x + a, g1, be1)
    hdn = jax.nn.gelu(jnp.einsum('bne,fe->bnf', r, w1) + b1, approximate=False)
    ffn = jnp.einsum('bnf,ef->bne', hdn, w2) + b2
    return r + ffn


if __name__ == "__main__":
    key = jax.random.PRNGKey(0)
    k_src, k_par = jax.random.split(key)
    src = jax.random.normal(k_src, (B, N, E), jnp.float32)   # (batch, tokens, d_model)
    params = init_params(k_par)
    wbuf = prepare_kernel_params(params)

    out = video_transformer_encoder_layer(src, wbuf)
    out = jax.block_until_ready(out)

    ref = reference(src, params)
    assert out.shape == (B, N, E)
    err = jnp.max(jnp.abs(out - ref))
    # Tolerance budget: EUP approximate reciprocals (softmax denom + GELU
    # rational, ~1e-4 rel each) plus the A&S erf polynomial (<2e-7) and the
    # host-side Wv@Wproj refactorization (fp32 reassociation, ~1e-6).
    assert jnp.allclose(out, ref, atol=2e-3, rtol=2e-3), f"max abs err {err}"
    print("KERNEL_OK")
</pallas_src>

<mosaic_0001>
module attributes {stable_mosaic.version = 11 : i64} {
  func.func @video_encoder_layer_kernel(%arg0: memref<16x32xf32, #tpu.memory_space<vmem>>, %arg1: memref<136x192xf32, #tpu.memory_space<vmem>>, %arg2: memref<16x32xf32, #tpu.memory_space<vmem>>) attributes {dimension_semantics = [], scalar_prefetch = 0 : i64, scratch_operands = 0 : i64, tpu.core_type = #tpu.core_type<tc>} {
    %c0 = arith.constant 0 : index
    %c0_0 = arith.constant 0 : index
    %0 = vector.load %arg0[%c0, %c0_0] : memref<16x32xf32, #tpu.memory_space<vmem>>, vector<16x32xf32>
    %c0_1 = arith.constant 0 : index
    %c0_2 = arith.constant 0 : index
    %1 = vector.load %arg1[%c0_1, %c0_2] : memref<136x192xf32, #tpu.memory_space<vmem>>, vector<32x192xf32>
    %c32 = arith.constant 32 : index
    %c0_3 = arith.constant 0 : index
    %2 = vector.load %arg1[%c32, %c0_3] : memref<136x192xf32, #tpu.memory_space<vmem>>, vector<32x64xf32>
    %c64 = arith.constant 64 : index
    %c0_4 = arith.constant 0 : index
    %3 = vector.load %arg1[%c64, %c0_4] : memref<136x192xf32, #tpu.memory_space<vmem>>, vector<64x32xf32>
    %c128 = arith.constant 128 : index
    %c0_5 = arith.constant 0 : index
    %4 = vector.load %arg1[%c128, %c0_5] : memref<136x192xf32, #tpu.memory_space<vmem>>, vector<8x64xf32>
    %5 = vector.extract_strided_slice %4 {offsets = [0, 0], sizes = [1, 32], strides = [1, 1]} : vector<8x64xf32> to vector<1x32xf32>
    %6 = vector.extract_strided_slice %4 {offsets = [1, 0], sizes = [1, 32], strides = [1, 1]} : vector<8x64xf32> to vector<1x32xf32>
    %7 = vector.extract_strided_slice %4 {offsets = [2, 0], sizes = [1, 32], strides = [1, 1]} : vector<8x64xf32> to vector<1x32xf32>
    %8 = vector.extract_strided_slice %4 {offsets = [3, 0], sizes = [1, 32], strides = [1, 1]} : vector<8x64xf32> to vector<1x32xf32>
    %9 = vector.extract_strided_slice %4 {offsets = [4, 0], sizes = [1, 32], strides = [1, 1]} : vector<8x64xf32> to vector<1x32xf32>
    %10 = vector.extract_strided_slice %4 {offsets = [5, 0], sizes = [1, 32], strides = [1, 1]} : vector<8x64xf32> to vector<1x32xf32>
    %11 = vector.extract_strided_slice %4 {offsets = [6, 0], sizes = [1, 64], strides = [1, 1]} : vector<8x64xf32> to vector<1x64xf32>
    %12 = tpu.iota {dimensions = array<i32: 0>} : vector<16x16xi32>
    %c3_i32 = arith.constant 3 : i32
    %13 = vector.broadcast %c3_i32 : i32 to vector<16x16xi32>
    %14 = arith.shrsi %12, %13 : vector<16x16xi32>
    %15 = tpu.iota {dimensions = array<i32: 1>} : vector<16x16xi32>
    %c3_i32_6 = arith.constant 3 : i32
    %16 = vector.broadcast %c3_i32_6 : i32 to vector<16x16xi32>
    %17 = arith.shrsi %15, %16 : vector<16x16xi32>
    %18 = arith.cmpi eq, %14, %17 : vector<16x16xi32>
    %cst = arith.constant 0.000000e+00 : f32
    %cst_7 = arith.constant -1.000000e+30 : f32
    %19 = vector.broadcast %cst : f32 to vector<16x16xf32>
    %20 = vector.broadcast %cst_7 : f32 to vector<16x16xf32>
    %21 = arith.select %18, %19, %20 : vector<16x16xi1>, vector<16x16xf32>
    %cst_8 = arith.constant dense<0.000000e+00> : vector<16xf32>
    %22 = vector.multi_reduction <add>, %0, %cst_8 [1] : vector<16x32xf32> to vector<16xf32>
    %23 = vector.shape_cast %22 : vector<16xf32> to vector<16x1xf32>
    %24 = arith.mulf %0, %0 : vector<16x32xf32>
    %cst_9 = arith.constant dense<0.000000e+00> : vector<16xf32>
    %25 = vector.multi_reduction <add>, %24, %cst_9 [1] : vector<16x32xf32> to vector<16xf32>
    %26 = vector.shape_cast %25 : vector<16xf32> to vector<16x1xf32>
    %cst_10 = arith.constant 3.125000e-02 : f32
    %27 = vector.broadcast %cst_10 : f32 to vector<16x1xf32>
    %28 = arith.mulf %23, %27 : vector<16x1xf32>
    %cst_11 = arith.constant 3.125000e-02 : f32
    %29 = vector.broadcast %cst_11 : f32 to vector<16x1xf32>
    %30 = arith.mulf %26, %29 : vector<16x1xf32>
    %31 = arith.mulf %28, %28 : vector<16x1xf32>
    %32 = arith.subf %30, %31 : vector<16x1xf32>
    %33 = vector.broadcast %28 : vector<16x1xf32> to vector<16x32xf32>
    %34 = arith.subf %0, %33 : vector<16x32xf32>
    %cst_12 = arith.constant 9.99999974E-6 : f32
    %35 = vector.broadcast %cst_12 : f32 to vector<16x1xf32>
    %36 = arith.addf %32, %35 : vector<16x1xf32>
    %37 = math.rsqrt %36 : vector<16x1xf32>
    %38 = vector.broadcast %37 : vector<16x1xf32> to vector<16x32xf32>
    %39 = arith.mulf %34, %38 : vector<16x32xf32>
    %40 = vector.broadcast %5 : vector<1x32xf32> to vector<16x32xf32>
    %41 = arith.mulf %39, %40 : vector<16x32xf32>
    %42 = vector.broadcast %6 : vector<1x32xf32> to vector<16x32xf32>
    %43 = arith.addf %41, %42 : vector<16x32xf32>
    %cst_13 = arith.constant dense<0.000000e+00> : vector<16x192xf32>
    %44 = tpu.matmul %43, %1, %cst_13 {dimension_numbers = #tpu.dot_dimension_numbers<[1], [0], [0], [1], [0, 0, 1, 1], [], []>} : vector<16x32xf32>, vector<32x192xf32>, vector<16x192xf32> -> vector<16x192xf32>
    %cst_14 = arith.constant 0.000000e+00 : f32
    %45 = vector.broadcast %cst_14 : f32 to vector<16x32xf32>
    %46 = vector.extract_strided_slice %44 {offsets = [0, 0], sizes = [16, 8], strides = [1, 1]} : vector<16x192xf32> to vector<16x8xf32>
    %47 = vector.extract_strided_slice %44 {offsets = [0, 32], sizes = [16, 8], strides = [1, 1]} : vector<16x192xf32> to vector<16x8xf32>
    %48 = vector.extract_strided_slice %44 {offsets = [0, 64], sizes = [16, 32], strides = [1, 1]} : vector<16x192xf32> to vector<16x32xf32>
    %cst_15 = arith.constant dense<0.000000e+00> : vector<16x16xf32>
    %49 = tpu.matmul %46, %47, %cst_15 {dimension_numbers = #tpu.dot_dimension_numbers<[1], [1], [0], [0], [0, 0, 1, 0], [], []>} : vector<16x8xf32>, vector<16x8xf32>, vector<16x16xf32> -> vector<16x16xf32>
    %50 = arith.addf %49, %21 : vector<16x16xf32>
    %cst_16 = arith.constant dense<0xFF800000> : vector<16xf32>
    %51 = vector.multi_reduction <maximumf>, %50, %cst_16 [1] : vector<16x16xf32> to vector<16xf32>
    %52 = vector.shape_cast %51 : vector<16xf32> to vector<16x1xf32>
    %53 = vector.broadcast %52 : vector<16x1xf32> to vector<16x16xf32>
    %54 = arith.subf %50, %53 : vector<16x16xf32>
    %55 = math.exp %54 : vector<16x16xf32>
    %cst_17 = arith.constant dense<0.000000e+00> : vector<16xf32>
    %56 = vector.multi_reduction <add>, %55, %cst_17 [1] : vector<16x16xf32> to vector<16xf32>
    %57 = vector.shape_cast %56 : vector<16xf32> to vector<16x1xf32>
    %58 = tpu.reciprocal %57 {approx = true} : vector<16x1xf32> -> vector<16x1xf32>
    %59 = vector.broadcast %58 : vector<16x1xf32> to vector<16x16xf32>
    %60 = arith.mulf %55, %59 : vector<16x16xf32>
    %cst_18 = arith.constant dense<0.000000e+00> : vector<16x32xf32>
    %61 = tpu.matmul %60, %48, %cst_18 {dimension_numbers = #tpu.dot_dimension_numbers<[1], [0], [0], [1], [0, 0, 1, 1], [], []>} : vector<16x16xf32>, vector<16x32xf32>, vector<16x32xf32> -> vector<16x32xf32>
    %62 = arith.addf %45, %61 : vector<16x32xf32>
    %63 = vector.extract_strided_slice %44 {offsets = [0, 8], sizes = [16, 8], strides = [1, 1]} : vector<16x192xf32> to vector<16x8xf32>
    %64 = vector.extract_strided_slice %44 {offsets = [0, 40], sizes = [16, 8], strides = [1, 1]} : vector<16x192xf32> to vector<16x8xf32>
    %65 = vector.extract_strided_slice %44 {offsets = [0, 96], sizes = [16, 32], strides = [1, 1]} : vector<16x192xf32> to vector<16x32xf32>
    %cst_19 = arith.constant dense<0.000000e+00> : vector<16x16xf32>
    %66 = tpu.matmul %63, %64, %cst_19 {dimension_numbers = #tpu.dot_dimension_numbers<[1], [1], [0], [0], [0, 0, 1, 0], [], []>} : vector<16x8xf32>, vector<16x8xf32>, vector<16x16xf32> -> vector<16x16xf32>
    %67 = arith.addf %66, %21 : vector<16x16xf32>
    %cst_20 = arith.constant dense<0xFF800000> : vector<16xf32>
    %68 = vector.multi_reduction <maximumf>, %67, %cst_20 [1] : vector<16x16xf32> to vector<16xf32>
    %69 = vector.shape_cast %68 : vector<16xf32> to vector<16x1xf32>
    %70 = vector.broadcast %69 : vector<16x1xf32> to vector<16x16xf32>
    %71 = arith.subf %67, %70 : vector<16x16xf32>
    %72 = math.exp %71 : vector<16x16xf32>
    %cst_21 = arith.constant dense<0.000000e+00> : vector<16xf32>
    %73 = vector.multi_reduction <add>, %72, %cst_21 [1] : vector<16x16xf32> to vector<16xf32>
    %74 = vector.shape_cast %73 : vector<16xf32> to vector<16x1xf32>
    %75 = tpu.reciprocal %74 {approx = true} : vector<16x1xf32> -> vector<16x1xf32>
    %76 = vector.broadcast %75 : vector<16x1xf32> to vector<16x16xf32>
    %77 = arith.mulf %72, %76 : vector<16x16xf32>
    %cst_22 = arith.constant dense<0.000000e+00> : vector<16x32xf32>
    %78 = tpu.matmul %77, %65, %cst_22 {dimension_numbers = #tpu.dot_dimension_numbers<[1], [0], [0], [1], [0, 0, 1, 1], [], []>} : vector<16x16xf32>, vector<16x32xf32>, vector<16x32xf32> -> vector<16x32xf32>
    %79 = arith.addf %62, %78 : vector<16x32xf32>
    %80 = vector.extract_strided_slice %44 {offsets = [0, 16], sizes = [16, 8], strides = [1, 1]} : vector<16x192xf32> to vector<16x8xf32>
    %81 = vector.extract_strided_slice %44 {offsets = [0, 48], sizes = [16, 8], strides = [1, 1]} : vector<16x192xf32> to vector<16x8xf32>
    %82 = vector.extract_strided_slice %44 {offsets = [0, 128], sizes = [16, 32], strides = [1, 1]} : vector<16x192xf32> to vector<16x32xf32>
    %cst_23 = arith.constant dense<0.000000e+00> : vector<16x16xf32>
    %83 = tpu.matmul %80, %81, %cst_23 {dimension_numbers = #tpu.dot_dimension_numbers<[1], [1], [0], [0], [0, 0, 1, 0], [], []>} : vector<16x8xf32>, vector<16x8xf32>, vector<16x16xf32> -> vector<16x16xf32>
    %84 = arith.addf %83, %21 : vector<16x16xf32>
    %cst_24 = arith.constant dense<0xFF800000> : vector<16xf32>
    %85 = vector.multi_reduction <maximumf>, %84, %cst_24 [1] : vector<16x16xf32> to vector<16xf32>
    %86 = vector.shape_cast %85 : vector<16xf32> to vector<16x1xf32>
    %87 = vector.broadcast %86 : vector<16x1xf32> to vector<16x16xf32>
    %88 = arith.subf %84, %87 : vector<16x16xf32>
    %89 = math.exp %88 : vector<16x16xf32>
    %cst_25 = arith.constant dense<0.000000e+00> : vector<16xf32>
    %90 = vector.multi_reduction <add>, %89, %cst_25 [1] : vector<16x16xf32> to vector<16xf32>
    %91 = vector.shape_cast %90 : vector<16xf32> to vector<16x1xf32>
    %92 = tpu.reciprocal %91 {approx = true} : vector<16x1xf32> -> vector<16x1xf32>
    %93 = vector.broadcast %92 : vector<16x1xf32> to vector<16x16xf32>
    %94 = arith.mulf %89, %93 : vector<16x16xf32>
    %cst_26 = arith.constant dense<0.000000e+00> : vector<16x32xf32>
    %95 = tpu.matmul %94, %82, %cst_26 {dimension_numbers = #tpu.dot_dimension_numbers<[1], [0], [0], [1], [0, 0, 1, 1], [], []>} : vector<16x16xf32>, vector<16x32xf32>, vector<16x32xf32> -> vector<16x32xf32>
    %96 = arith.addf %79, %95 : vector<16x32xf32>
    %97 = vector.extract_strided_slice %44 {offsets = [0, 24], sizes = [16, 8], strides = [1, 1]} : vector<16x192xf32> to vector<16x8xf32>
    %98 = vector.extract_strided_slice %44 {offsets = [0, 56], sizes = [16, 8], strides = [1, 1]} : vector<16x192xf32> to vector<16x8xf32>
    %99 = vector.extract_strided_slice %44 {offsets = [0, 160], sizes = [16, 32], strides = [1, 1]} : vector<16x192xf32> to vector<16x32xf32>
    %cst_27 = arith.constant dense<0.000000e+00> : vector<16x16xf32>
    %100 = tpu.matmul %97, %98, %cst_27 {dimension_numbers = #tpu.dot_dimension_numbers<[1], [1], [0], [0], [0, 0, 1, 0], [], []>} : vector<16x8xf32>, vector<16x8xf32>, vector<16x16xf32> -> vector<16x16xf32>
    %101 = arith.addf %100, %21 : vector<16x16xf32>
    %cst_28 = arith.constant dense<0xFF800000> : vector<16xf32>
    %102 = vector.multi_reduction <maximumf>, %101, %cst_28 [1] : vector<16x16xf32> to vector<16xf32>
    %103 = vector.shape_cast %102 : vector<16xf32> to vector<16x1xf32>
    %104 = vector.broadcast %103 : vector<16x1xf32> to vector<16x16xf32>
    %105 = arith.subf %101, %104 : vector<16x16xf32>
    %106 = math.exp %105 : vector<16x16xf32>
    %cst_29 = arith.constant dense<0.000000e+00> : vector<16xf32>
    %107 = vector.multi_reduction <add>, %106, %cst_29 [1] : vector<16x16xf32> to vector<16xf32>
    %108 = vector.shape_cast %107 : vector<16xf32> to vector<16x1xf32>
    %109 = tpu.reciprocal %108 {approx = true} : vector<16x1xf32> -> vector<16x1xf32>
    %110 = vector.broadcast %109 : vector<16x1xf32> to vector<16x16xf32>
    %111 = arith.mulf %106, %110 : vector<16x16xf32>
    %cst_30 = arith.constant dense<0.000000e+00> : vector<16x32xf32>
    %112 = tpu.matmul %111, %99, %cst_30 {dimension_numbers = #tpu.dot_dimension_numbers<[1], [0], [0], [1], [0, 0, 1, 1], [], []>} : vector<16x16xf32>, vector<16x32xf32>, vector<16x32xf32> -> vector<16x32xf32>
    %113 = arith.addf %96, %112 : vector<16x32xf32>
    %114 = vector.broadcast %7 : vector<1x32xf32> to vector<16x32xf32>
    %115 = arith.addf %113, %114 : vector<16x32xf32>
    %116 = arith.addf %0, %115 : vector<16x32xf32>
    %cst_31 = arith.constant dense<0.000000e+00> : vector<16xf32>
    %117 = vector.multi_reduction <add>, %116, %cst_31 [1] : vector<16x32xf32> to vector<16xf32>
    %118 = vector.shape_cast %117 : vector<16xf32> to vector<16x1xf32>
    %119 = arith.mulf %116, %116 : vector<16x32xf32>
    %cst_32 = arith.constant dense<0.000000e+00> : vector<16xf32>
    %120 = vector.multi_reduction <add>, %119, %cst_32 [1] : vector<16x32xf32> to vector<16xf32>
    %121 = vector.shape_cast %120 : vector<16xf32> to vector<16x1xf32>
    %cst_33 = arith.constant 3.125000e-02 : f32
    %122 = vector.broadcast %cst_33 : f32 to vector<16x1xf32>
    %123 = arith.mulf %118, %122 : vector<16x1xf32>
    %cst_34 = arith.constant 3.125000e-02 : f32
    %124 = vector.broadcast %cst_34 : f32 to vector<16x1xf32>
    %125 = arith.mulf %121, %124 : vector<16x1xf32>
    %126 = arith.mulf %123, %123 : vector<16x1xf32>
    %127 = arith.subf %125, %126 : vector<16x1xf32>
    %128 = vector.broadcast %123 : vector<16x1xf32> to vector<16x32xf32>
    %129 = arith.subf %116, %128 : vector<16x32xf32>
    %cst_35 = arith.constant 9.99999974E-6 : f32
    %130 = vector.broadcast %cst_35 : f32 to vector<16x1xf32>
    %131 = arith.addf %127, %130 : vector<16x1xf32>
    %132 = math.rsqrt %131 : vector<16x1xf32>
    %133 = vector.broadcast %132 : vector<16x1xf32> to vector<16x32xf32>
    %134 = arith.mulf %129, %133 : vector<16x32xf32>
    %135 = vector.broadcast %8 : vector<1x32xf32> to vector<16x32xf32>
    %136 = arith.mulf %134, %135 : vector<16x32xf32>
    %137 = vector.broadcast %9 : vector<1x32xf32> to vector<16x32xf32>
    %138 = arith.addf %136, %137 : vector<16x32xf32>
    %cst_36 = arith.constant dense<0.000000e+00> : vector<16x64xf32>
    %139 = tpu.matmul %138, %2, %cst_36 {dimension_numbers = #tpu.dot_dimension_numbers<[1], [0], [0], [1], [0, 0, 1, 1], [], []>} : vector<16x32xf32>, vector<32x64xf32>, vector<16x64xf32> -> vector<16x64xf32>
    %140 = vector.broadcast %11 : vector<1x64xf32> to vector<16x64xf32>
    %141 = arith.addf %139, %140 : vector<16x64xf32>
    %cst_37 = arith.constant 0.707106769 : f32
    %142 = vector.broadcast %cst_37 : f32 to vector<16x64xf32>
    %143 = arith.mulf %141, %142 : vector<16x64xf32>
    %cst_38 = arith.constant 0.000000e+00 : f32
    %144 = vector.broadcast %cst_38 : f32 to vector<16x64xf32>
    %145 = arith.cmpf oge, %143, %144 : vector<16x64xf32>
    %cst_39 = arith.constant 1.000000e+00 : f32
    %cst_40 = arith.constant -1.000000e+00 : f32
    %146 = vector.broadcast %cst_39 : f32 to vector<16x64xf32>
    %147 = vector.broadcast %cst_40 : f32 to vector<16x64xf32>
    %148 = arith.select %145, %146, %147 : vector<16x64xi1>, vector<16x64xf32>
    %149 = math.absf %143 : vector<16x64xf32>
    %cst_41 = arith.constant 0.327591091 : f32
    %150 = vector.broadcast %cst_41 : f32 to vector<16x64xf32>
    %151 = arith.mulf %150, %149 : vector<16x64xf32>
    %cst_42 = arith.constant 1.000000e+00 : f32
    %152 = vector.broadcast %cst_42 : f32 to vector<16x64xf32>
    %153 = arith.addf %152, %151 : vector<16x64xf32>
    %154 = tpu.reciprocal %153 {approx = true} : vector<16x64xf32> -> vector<16x64xf32>
    %cst_43 = arith.constant 1.06140542 : f32
    %155 = vector.broadcast %cst_43 : f32 to vector<16x64xf32>
    %156 = arith.mulf %154, %155 : vector<16x64xf32>
    %cst_44 = arith.constant -1.45315206 : f32
    %157 = vector.broadcast %cst_44 : f32 to vector<16x64xf32>
    %158 = arith.addf %157, %156 : vector<16x64xf32>
    %159 = arith.mulf %154, %158 : vector<16x64xf32>
    %cst_45 = arith.constant 1.42141378 : f32
    %160 = vector.broadcast %cst_45 : f32 to vector<16x64xf32>
    %161 = arith.addf %160, %159 : vector<16x64xf32>
    %162 = arith.mulf %154, %161 : vector<16x64xf32>
    %cst_46 = arith.constant -0.284496725 : f32
    %163 = vector.broadcast %cst_46 : f32 to vector<16x64xf32>
    %164 = arith.addf %163, %162 : vector<16x64xf32>
    %165 = arith.mulf %154, %164 : vector<16x64xf32>
    %cst_47 = arith.constant 0.254829586 : f32
    %166 = vector.broadcast %cst_47 : f32 to vector<16x64xf32>
    %167 = arith.addf %166, %165 : vector<16x64xf32>
    %168 = arith.mulf %154, %167 : vector<16x64xf32>
    %cst_48 = arith.constant 0.000000e+00 : f32
    %169 = vector.broadcast %cst_48 : f32 to vector<16x64xf32>
    %170 = arith.subf %169, %149 : vector<16x64xf32>
    %171 = arith.mulf %170, %149 : vector<16x64xf32>
    %172 = math.exp %171 : vector<16x64xf32>
    %173 = arith.mulf %168, %172 : vector<16x64xf32>
    %cst_49 = arith.constant 1.000000e+00 : f32
    %174 = vector.broadcast %cst_49 : f32 to vector<16x64xf32>
    %175 = arith.subf %174, %173 : vector<16x64xf32>
    %176 = arith.mulf %148, %175 : vector<16x64xf32>
    %cst_50 = arith.constant 5.000000e-01 : f32
    %177 = vector.broadcast %cst_50 : f32 to vector<16x64xf32>
    %178 = arith.mulf %177, %141 : vector<16x64xf32>
    %cst_51 = arith.constant 1.000000e+00 : f32
    %179 = vector.broadcast %cst_51 : f32 to vector<16x64xf32>
    %180 = arith.addf %179, %176 : vector<16x64xf32>
    %181 = arith.mulf %178, %180 : vector<16x64xf32>
    %cst_52 = arith.constant dense<0.000000e+00> : vector<16x32xf32>
    %182 = tpu.matmul %181, %3, %cst_52 {dimension_numbers = #tpu.dot_dimension_numbers<[1], [0], [0], [1], [0, 0, 1, 1], [], []>} : vector<16x64xf32>, vector<64x32xf32>, vector<16x32xf32> -> vector<16x32xf32>
    %183 = vector.broadcast %10 : vector<1x32xf32> to vector<16x32xf32>
    %184 = arith.addf %182, %183 : vector<16x32xf32>
    %185 = arith.addf %138, %184 : vector<16x32xf32>
    %c0_53 = arith.constant 0 : index
    %c0_54 = arith.constant 0 : index
    %186 = vector.load %arg2[%c0_53, %c0_54] : memref<16x32xf32, #tpu.memory_space<vmem>>, vector<16x32xf32>
    tpu.vector_store %arg2[%c0_53, %c0_54], %185 {strides = array<i32>} : memref<16x32xf32, #tpu.memory_space<vmem>>, vector<16x32xf32>,
    return
  }
}

</mosaic_0001>

<bundles_post_ra>
// kernel: video_transformer_encoder_layer.1
= control target key start
LH: loop header
LB: loop body
LE: loop exit
PB: predicated region body
PF: predicated region fallthrough
CT: control target
= control target key end

     0   :  { %7 = vsyncpa [#allocation3], 0  ;;  %s1951_s0 = inlined_call_operand.hbm [shape: f32[16,32], index: 0, kind: input, shape index: {}]   ;;  %s1952_s1 = inlined_call_operand.hbm [shape: f32[136,192], index: 1, kind: input, shape index: {}]   ;;  %s1953_s2 = inlined_call_operand.hbm [shape: f32[16,32], index: 2, kind: output, shape index: {}]  }
   0x1   :  { %8 = vsyncpa [#allocation6], 0 }
   0x2   :  { %9 = vsyncpa [#allocation4], 0  ;;  %s1712_s9 = smov [#allocation2]   ;;  %s1640_s13 = scalar_lea.hbm %s1951_s0, 256 }
   0x3   :  { %s15_s10 = sshll.u32 %s1712_s9, 4  ;;  %p1641_p0 = scmp.ne.s32.totalorder %s1951_s0, %s1640_s13  ;;  %s16_s10 = int_to_ptr.vmem [resolvable:$true] %s15_s10 }
   0x4   :  { %p1644_p1 = scmp.lt.u32.totalorder %s1640_s13, %s1951_s0 }
   0x6   :  { %p1646_p2 = pnand %p1644_p1, %p1641_p0 }
   0x8   :  { %1649 = shalt.err (!%p1646_p2)
}
   0x9   :  { %s1650_s18 = scalar_lea.vmem %s16_s10, 256  ;;  %p1655_p4 = scmp.lt.s32.totalorder %s16_s10, %s16_s10 }
   0xa   :  { %p1651_p3 = scmp.ne.s32.totalorder %s16_s10, %s1650_s18  ;;  %p1656_p5 = scmp.lt.s32.totalorder %s1650_s18, %s1650_s18 }
   0xc   :  { %p1657_p6 = por %p1656_p5, %p1655_p4 }
   0xe   :  { %p1658_p7 = pnand %p1657_p6, %p1651_p3 }
  0x10   :  { %1661 = shalt.err (!%p1658_p7)
}
  0x11   :  { %s1713_s19 = smov 128   ;;  %s1714_s20 = smov 8  }
  0x12   :  { %21 = dma.hbm_to_vmem [thread:$0]  %s1951_s0, 256, %s16_s10, [#allocation3], %s1713_s19, %s1713_s19, %s1714_s20  }
  0x13   :  { %s1715_s23 = smov [#allocation5]   ;;  %s1662_s27 = scalar_lea.hbm %s1952_s1, 4352 }
  0x14   :  { %s27_s24 = sshll.u32 %s1715_s23, 4  ;;  %p1663_p8 = scmp.ne.s32.totalorder %s1952_s1, %s1662_s27  ;;  %s28_s24 = int_to_ptr.vmem [resolvable:$true] %s27_s24 }
  0x15   :  { %p1666_p9 = scmp.lt.u32.totalorder %s1662_s27, %s1952_s1 }
  0x17   :  { %p1668_p10 = pnand %p1666_p9, %p1663_p8 }
  0x19   :  { %1671 = shalt.err (!%p1668_p10)
}
  0x1a   :  { %s1672_s4 = scalar_lea.vmem %s28_s24, 4352  ;;  %p1677_p12 = scmp.lt.s32.totalorder %s28_s24, %s28_s24 }
  0x1b   :  { %p1673_p11 = scmp.ne.s32.totalorder %s28_s24, %s1672_s4  ;;  %p1678_p13 = scmp.lt.s32.totalorder %s1672_s4, %s1672_s4 }
  0x1d   :  { %p1679_p0 = por %p1678_p13, %p1677_p12 }
  0x1f   :  { %p1680_p1 = pnand %p1679_p0, %p1673_p11 }
  0x21   :  { %1683 = shalt.err (!%p1680_p1)
}
  0x22   :  { %s1716_s0 = smov 256   ;;  %s1717_s5 = smov 16  }
  0x23   :  { %33 = dma.hbm_to_vmem [thread:$0]  %s1952_s1, 4352, %s28_s24, [#allocation6], %s1716_s0, %s1716_s0, %s1717_s5  }
  0x24   :  { %1706 = dma.done.wait [#allocation3], 256  }
  0x25   :  { %1707 = vsyncadd [#allocation3], 4294967040 }
  0x26   :  { %1708 = dma.done.wait [#allocation6], 4352  }
  0x27   :  { %1709 = vsyncadd [#allocation6], 4294962944  ;;  %vm75_vm0 = vcmask 261120   ;;  %v1773_v0 = vld [vmem:[#allocation2 + $0x8] sm:$0xff]  ;;  %v1775_v1 = vld [vmem:[#allocation2] sm:$0xff]  ;;  %v1718_v15 = vmov 0.0   ;;  %v63_v35 = vlaneseq }
  0x28   :  { %v79_v2 = vsel %vm75_vm0, %v1773_v0, 0.0  ;;  %v76_v3 = vsel %vm75_vm0, %v1775_v1, 0.0  ;;  %v83_v4 = vmul.f32 %v1773_v0, %v1773_v0  ;;  %v82_v5 = vmul.f32 %v1775_v1, %v1775_v1  ;;  %v43_v8 = vld [vmem:[#allocation5 + $0x8] sm:$0xff]  ;;  %v45_v9 = vld [vmem:[#allocation5 + $0x18] sm:$0xff]  ;;  %v42_v10 = vld [vmem:[#allocation5] sm:$0xff]  ;;  %188 = vmatprep.mubr.f32.mxu1 %v1718_v15  ;;  %s1719_s1 = smov 120  }
  0x29   :  { %80 = vadd.xlane.f32.xlu1 %v79_v2  ;;  %77 = vadd.xlane.f32.xlu0 %v76_v3  ;;  %v1460_v11 = vpack.c.bf16 %v45_v9, %v43_v8  ;;  %v44_v12 = vld [vmem:[#allocation5 + $0x10] sm:$0xff]  ;;  %v47_v13 = vld [vmem:[#allocation5 + $0x28] sm:$0xff]  ;;  %v49_v14 = vld [vmem:[#allocation5 + $0x38] sm:$0xff]  ;;  %v1788_v36 = vshrl.u32 %v63_v35, 7  ;;  %vm207_vm1 = vcmask 64512   ;;  %s1720_s8 = smov 96  }
  0x2a   :  { %v87_v6 = vsel %vm75_vm0, %v83_v4, 0.0  ;;  %v84_v7 = vsel %vm75_vm0, %v82_v5, 0.0  ;;  %v1462_v16 = vpack.c.bf16 %v44_v12, %v42_v10  ;;  %v1464_v17 = vpack.c.bf16 %v49_v14, %v47_v13  ;;  %v46_v18 = vld [vmem:[#allocation5 + $0x20] sm:$0xff]  ;;  %v48_v19 = vld [vmem:[#allocation5 + $0x30] sm:$0xff]  ;;  %s1721_s9 = smov 88   ;;  %s1722_s10 = smov 80   ;;  %vm1831_vm2 = vmpackc.low %vm207_vm1, %vm207_vm1 }
  0x2b   :  { %1461 = vmatprep.subr.bf16.mxu1 %v1460_v11  ;;  %v1466_v20 = vpack.c.bf16 %v48_v19, %v46_v18  ;;  %v108_v37 = vsub.s32 0, %v1788_v36  ;;  %v1791_v38 = vld [vmem:[#allocation5 + $0x100] sm:$0xff]  ;;  %v114_v39 = vsub.s32 1, %v1788_v36  ;;  %s1723_s11 = smov 112   ;;  %v65_v14 = vadd.s32 8, %v1788_v36  ;;  %s1725_s12 = smov 32  }
  0x2c   :  { %1463 = vmatpush1.bf16.msra.mxu1 %v1462_v16  ;;  %v66_v18 = vshra.s32 %v1788_v36, 3  ;;  %v1724_v19 = vmov -1e+30   ;;  %vm291_vm5 = vcmask 130048   ;;  %s1726_s13 = smov 72   ;;  %s1727_s14 = smov 104  }
  0x2d   :  { %88 = vadd.xlane.f32.xlu1 %v87_v6  ;;  %85 = vadd.xlane.f32.xlu0 %v84_v7  ;;  %v109_v43 = vrot.slane %v1791_v38, %v108_v37  ;;  %v115_v46 = vrot.slane %v1791_v38, %v114_v39  ;;  %v67_v16 = vshra.s32 %v65_v14, 3  ;;  %s1728_s15 = smov 64   ;;  %vm1192_vm8 = vcmask 523264   ;;  %s1730_s16 = smov [#allocation7]  }
  0x2e   :  { %1465 = vmatprep.subr.bf16.mxu1 %v1464_v17  ;;  %s1283_s17 = sshll.u32 %s1730_s16, 4  ;;  %s1284_s17 = int_to_ptr.vmem [resolvable:$true] %s1283_s17 }
  0x2f   :  { %s1684_s18 = scalar_lea.vmem %s1284_s17, 256  ;;  %p1689_p3 = scmp.lt.s32.totalorder %s1284_s17, %s1284_s17 }
  0x30   :  { %1467 = vmatpush1.bf16.msra.mxu1 %v1466_v20  ;;  %p1685_p2 = scmp.ne.s32.totalorder %s1284_s17, %s1684_s18  ;;  %p1690_p4 = scmp.lt.s32.totalorder %s1684_s18, %s1684_s18 }
  0x32   :  { %p1691_p5 = por %p1690_p4, %p1689_p3 }
  0x34   :  { %p1692_p6 = pnand %p1691_p5, %p1685_p2 }
  0xb6   :  { %v81_v21 = vpop.xlane.xlu1 %80  ;;  %v78_v22 = vpop.xlane.xlu0 %77 }
  0xb7   :  { %v91_v23 = vmul.f32 0.03125, %v81_v21  ;;  %v90_v24 = vmul.f32 0.03125, %v78_v22 }
  0xb9   :  { %v95_v25 = vmul.f32 %v91_v23, %v91_v23  ;;  %v94_v28 = vmul.f32 %v90_v24, %v90_v24  ;;  %v99_v41 = vsub.f32 %v1773_v0, %v91_v23  ;;  %v98_v42 = vsub.f32 %v1775_v1, %v90_v24 }
  0xba   :  { %v89_v26 = vpop.xlane.xlu1 %88  ;;  %v86_v27 = vpop.xlane.xlu0 %85 }
  0xbb   :  { %v93_v29 = vmul.f32 0.03125, %v89_v26  ;;  %v92_v30 = vmul.f32 0.03125, %v86_v27 }
  0xbd   :  { %v97_v31 = vsub.f32 %v93_v29, %v95_v25  ;;  %v96_v32 = vsub.f32 %v92_v30, %v94_v28 }
  0xbf   :  { %v101_v33 = vadd.f32 1e-05, %v97_v31  ;;  %v100_v34 = vadd.f32 1e-05, %v96_v32 }
  0xc1   :  { %1592 = vrsqrt.f32 %v101_v33 }
  0xc2   :  { %1594 = vrsqrt.f32 %v100_v34 }
  0xcb   :  { %v1593_v40 = vpop.eup %1592 }
  0xcc   :  { %v1595_v44 = vpop.eup %1594  ;;  %v105_v47 = vmul.f32 %v1593_v40, %v99_v41 }
  0xcd   :  { %v104_v45 = vmul.f32 %v1595_v44, %v98_v42 }
  0xce   :  { %v111_v50 = vmul.f32 %v109_v43, %v105_v47 }
  0xcf   :  { %v110_v48 = vmul.f32 %v109_v43, %v104_v45 }
  0xd0   :  { %v117_v51 = vadd.f32 %v115_v46, %v111_v50 }
  0xd1   :  { %v116_v49 = vadd.f32 %v115_v46, %v110_v48 }
  0xd3   :  { %1296 = vmatmul.mubr.msk.f32.vlgmr.msra.gmra.mrb[0].mxu1 %vm75_vm0, %v116_v49 }
  0xd4   :  { %194 = vmatprep.mubr.f32.mxu1 %v1718_v15  ;;  %v69_v15 = vand.u32 127, %v63_v35 }
  0xd6   :  { %v70_v17 = vshra.s32 %v69_v15, 3 }
  0xd7   :  { %1297 = vmatmul.mubr.msk.f32.gmra.mrb[2].mxu1 %vm75_vm0, %v117_v51 }
  0xd8   :  { %vm72_vm3 = vcmp.eq.s32.totalorder %v67_v16, %v70_v17  ;;  %vm71_vm4 = vcmp.eq.s32.totalorder %v66_v18, %v70_v17 }
  0xd9   :  { %v1855_v20 = vsel %vm72_vm3, 0.0, %v1724_v19  ;;  %v1857_v21 = vsel %vm71_vm4, 0.0, %v1724_v19 }
 0x1a6   :  { %v1800_v52 = vpop.f32.mrb[0].mxu1 }
 0x1a7   :  { %314 = vrot.lane.b32.xlu1 %v1800_v52, %s1719_s1  ;;  %v1803_v53 = vpop.f32.mrb[1].mxu1  ;;  %1378 = vmatprep.mubr.msk.f32.mxu1 %vm207_vm1, %v1800_v52 }
 0x1aa   :  { %v1807_v54 = vpop.f32.mrb[2].mxu1 }
 0x1ab   :  { %v1809_v55 = vpop.f32.mrb[3].mxu1  ;;  %v1813_v56 = vpack.i.bf16 %v1807_v54, %v1800_v52 }
 0x1ac   :  { %v1587_v57 = vpack.i.bf16 %v1809_v55, %v1803_v53  ;;  %v1819_v58 = vpack.c.bf16 %v1809_v55, %v1803_v53  ;;  %v1003_v53 = vsub.s32 2, %v1788_v36 }
 0x1ad   :  { %1563 = vrot.lane.b32.xlu1 %v1813_v56, %s1720_s8  ;;  %1558 = vrot.lane.b32.xlu0 %v1813_v56, %s1721_s9 }
 0x1ae   :  { %v1004_v55 = vrot.slane %v1791_v38, %v1003_v53 }
 0x1b1   :  { %316 = vrot.lane.b32.xlu1 %v1807_v54, %s1719_s1  ;;  %1568 = vrot.lane.b32.xlu0 %v1813_v56, %s1722_s10 }
 0x1b5   :  { %601 = vrot.lane.b32.xlu1 %v1800_v52, %s1723_s11  ;;  %603 = vrot.lane.b32.xlu0 %v1807_v54, %s1723_s11 }
 0x219   :  { %v315_v59 = vpop.permute.xlu1 %314 }
 0x21a   :  { %1385 = vmatprep.mubr.msk.f32.mxu0 %vm207_vm1, %v315_v59 }
 0x21f   :  { %v1564_v60 = vpop.permute.xlu1 %1563  ;;  %v1559_v61 = vpop.permute.xlu0 %1558 }
 0x220   :  { %v1566_v62 = vunpack.i.h.bf16 %v1564_v60  ;;  %v1565_v63 = vunpack.i.l.bf16 %v1564_v60  ;;  %v1561_v2 = vunpack.i.h.bf16 %v1559_v61  ;;  %v1560_v3 = vunpack.i.l.bf16 %v1559_v61 }
 0x222   :  { %v1468_v5 = vpack.c.bf16 %v1566_v62, %v1565_v63  ;;  %v1474_v6 = vpack.c.bf16 %v1561_v2, %v1560_v3 }
 0x223   :  { %v1569_v7 = vpop.permute.xlu0 %1568  ;;  %v317_v10 = vpop.permute.xlu1 %316 }
 0x224   :  { %v1571_v8 = vunpack.i.h.bf16 %v1569_v7  ;;  %v1570_v9 = vunpack.i.l.bf16 %v1569_v7  ;;  %1470 = vmatprep.subr.msk.bf16.mxu1 %vm1831_vm2, %v1468_v5  ;;  %1476 = vmatprep.subr.msk.bf16.mxu0 %vm1831_vm2, %v1474_v6 }
 0x225   :  { %1473 = vmatpush3.bf16.xpose.msk.msra.mxu1 %vm1831_vm2, %v1468_v5  ;;  %1479 = vmatpush3.bf16.xpose.msk.msra.mxu0 %vm1831_vm2, %v1474_v6 }
 0x226   :  { %v1488_v11 = vpack.c.bf16 %v1571_v8, %v1570_v9 }
 0x227   :  { %v602_v12 = vpop.permute.xlu1 %601  ;;  %v604_v13 = vpop.permute.xlu0 %603 }
 0x228   :  { %1490 = vmatprep.subr.msk.bf16.mxu0 %vm1831_vm2, %v1488_v11 }
 0x22c   :  { %1379 = vmatmul.mubr.msk.f32.vlgmr.msra.gmra.mrb[4].mxu1 %vm207_vm1, %v1807_v54  ;;  %1386 = vmatmul.mubr.msk.f32.vlgmr.msra.gmra.mrb[0].mxu0 %vm207_vm1, %v317_v10 }
 0x22d   :  { %1493 = vmatpush3.bf16.xpose.msk.msra.mxu0 %vm1831_vm2, %v1488_v11  ;;  %1406 = vmatprep.mubr.msk.f32.mxu0 %vm207_vm1, %v602_v12 }
 0x234   :  { %1407 = vmatmul.mubr.msk.f32.vlgmr.msra.gmra.mrb[2].mxu0 %vm207_vm1, %v604_v13 }
 0x2ff   :  { %v1380_v22 = vpop.f32.mrb[4].mxu1  ;;  %v1387_v23 = vpop.f32.mrb[0].mxu0 }
 0x300   :  { %v402_v24 = vadd.f32 %v1387_v23, %v1855_v20  ;;  %v282_v25 = vpop.f32.mrb[5].mxu1  ;;  %v396_v26 = vpop.f32.mrb[1].mxu0  ;;  %v288_v31 = vadd.f32 %v1380_v22, %v1855_v20 }
 0x301   :  { %v397_v27 = vadd.f32 %v396_v26, %v1857_v21  ;;  %v283_v28 = vadd.f32 %v282_v25, %v1857_v21 }
 0x302   :  { %v408_v29 = vsel %vm291_vm5, %v402_v24, -inf  ;;  %v295_v39 = vsel %vm291_vm5, %v288_v31, -inf }
 0x303   :  { %409 = vmax.xlane.f32.xlu0 %v408_v29  ;;  %v405_v30 = vsel %vm291_vm5, %v397_v27, -inf  ;;  %v292_v32 = vsel %vm291_vm5, %v283_v28, -inf }
 0x304   :  { %406 = vmax.xlane.f32.xlu1 %v405_v30 }
 0x307   :  { %v1408_v33 = vpop.f32.mrb[2].mxu0  ;;  %293 = vmax.xlane.f32.xlu0 %v292_v32 }
 0x308   :  { %v683_v34 = vpop.f32.mrb[3].mxu0  ;;  %v689_v37 = vadd.f32 %v1408_v33, %v1855_v20 }
 0x309   :  { %v684_v35 = vadd.f32 %v683_v34, %v1857_v21 }
 0x30a   :  { %v695_v41 = vsel %vm291_vm5, %v689_v37, -inf }
 0x30b   :  { %296 = vmax.xlane.f32.xlu0 %v295_v39  ;;  %v692_v40 = vsel %vm291_vm5, %v684_v35, -inf }
 0x30c   :  { %693 = vmax.xlane.f32.xlu1 %v692_v40 }
 0x30f   :  { %696 = vmax.xlane.f32.xlu0 %v695_v41 }
 0x31d   :  { %1573 = vrot.lane.b32.xlu1 %v1813_v56, %s1725_s12 }
 0x390   :  { %v410_v42 = vpop.xlane.xlu0 %409 }
 0x391   :  { %v412_v43 = vsub.f32 %v402_v24, %v410_v42  ;;  %v407_v44 = vpop.xlane.xlu1 %406 }
 0x392   :  { %v411_v45 = vsub.f32 %v397_v27, %v407_v44 }
 0x393   :  { %v415_v46 = vmul.f32 1.442695, %v412_v43 }
 0x394   :  { %v413_v47 = vmul.f32 1.442695, %v411_v45  ;;  %v294_v48 = vpop.xlane.xlu0 %293 }
 0x395   :  { %1596 = vpow2.f32 %v415_v46  ;;  %v298_v49 = vsub.f32 %v283_v28, %v294_v48 }
 0x396   :  { %1598 = vpow2.f32 %v413_v47 }
 0x397   :  { %v300_v50 = vmul.f32 1.442695, %v298_v49 }
 0x398   :  { %v297_v51 = vpop.xlane.xlu0 %296 }
 0x399   :  { %1600 = vpow2.f32 %v300_v50  ;;  %v299_v59 = vsub.f32 %v288_v31, %v297_v51  ;;  %v694_v60 = vpop.xlane.xlu1 %693 }
 0x39a   :  { %v698_v18 = vsub.f32 %v684_v35, %v694_v60 }
 0x39b   :  { %v302_v61 = vmul.f32 1.442695, %v299_v59 }
 0x39c   :  { %v697_v62 = vpop.xlane.xlu0 %696  ;;  %v700_v19 = vmul.f32 1.442695, %v698_v18 }
 0x39d   :  { %1602 = vpow2.f32 %v302_v61  ;;  %v699_v63 = vsub.f32 %v689_v37, %v697_v62  ;;  %v1574_v2 = vpop.permute.xlu1 %1573 }
 0x39e   :  { %v1576_v3 = vunpack.i.h.bf16 %v1574_v2  ;;  %v1575_v5 = vunpack.i.l.bf16 %v1574_v2 }
 0x39f   :  { %v1597_v6 = vpop.eup %1596  ;;  %v702_v7 = vmul.f32 1.442695, %v699_v63 }
 0x3a0   :  { %v1599_v8 = vpop.eup %1598  ;;  %v1480_v9 = vpack.c.bf16 %v1576_v3, %v1575_v5  ;;  %v420_v10 = vsel %vm291_vm5, %v1597_v6, 0.0 }
 0x3a1   :  { %1604 = vpow2.f32 %v702_v7  ;;  %421 = vadd.xlane.f32.xlu0 %v420_v10  ;;  %v417_v11 = vsel %vm291_vm5, %v1599_v8, 0.0 }
 0x3a2   :  { %418 = vadd.xlane.f32.xlu1 %v417_v11  ;;  %1481 = vmatprep.subr.bf16.mxu1 %v1480_v9  ;;  %1606 = vpow2.f32 %v700_v19 }
 0x3a3   :  { %v1601_v12 = vpop.eup %1600  ;;  %1483 = vmatpush3.bf16.msra.mxu1 %v1480_v9 }
 0x3a4   :  { %v304_v13 = vsel %vm291_vm5, %v1601_v12, 0.0 }
 0x3a6   :  { %305 = vadd.xlane.f32.xlu1 %v304_v13 }
 0x3a7   :  { %v1603_v14 = vpop.eup %1602 }
 0x3a8   :  { %v307_v15 = vsel %vm291_vm5, %v1603_v14, 0.0 }
 0x3a9   :  { %308 = vadd.xlane.f32.xlu0 %v307_v15 }
 0x3ab   :  { %v1605_v16 = vpop.eup %1604 }
 0x3ac   :  { %v707_v17 = vsel %vm291_vm5, %v1605_v16, 0.0  ;;  %v1607_v22 = vpop.eup %1606 }
 0x3ad   :  { %708 = vadd.xlane.f32.xlu0 %v707_v17  ;;  %v704_v23 = vsel %vm291_vm5, %v1607_v22, 0.0 }
 0x3b7   :  { %1583 = vrot.lane.b32.xlu1 %v1813_v56, %s1726_s13 }
 0x3bb   :  { %797 = vrot.lane.b32.xlu1 %v1800_v52, %s1727_s14 }
 0x3c3   :  { %1578 = vrot.lane.b32.xlu0 %v1813_v56, %s1728_s15 }
 0x3df   :  { %705 = vadd.xlane.f32.xlu1 %v704_v23 }
 0x3f0   :  { %799 = vrot.lane.b32.xlu1 %v1807_v54, %s1727_s14 }
 0x42e   :  { %v422_v24 = vpop.xlane.xlu0 %421 }
 0x42f   :  { %1608 = vrcp.f32 %v422_v24  ;;  %v419_v25 = vpop.xlane.xlu1 %418 }
 0x430   :  { %1610 = vrcp.f32 %v419_v25 }
 0x433   :  { %v306_v26 = vpop.xlane.xlu1 %305 }
 0x434   :  { %1612 = vrcp.f32 %v306_v26 }
 0x436   :  { %v309_v27 = vpop.xlane.xlu0 %308 }
 0x437   :  { %1614 = vrcp.f32 %v309_v27  ;;  %v1584_v35 = vpop.permute.xlu1 %1583 }
 0x438   :  { %v1586_v40 = vunpack.i.h.bf16 %v1584_v35  ;;  %v1585_v41 = vunpack.i.l.bf16 %v1584_v35 }
 0x439   :  { %v1609_v52 = vpop.eup %1608 }
 0x43a   :  { %v1611_v28 = vpop.eup %1610  ;;  %v709_v56 = vpop.xlane.xlu0 %708  ;;  %v426_v30 = vmul.f32 %v1609_v52, %v1597_v6  ;;  %v1498_v43 = vpack.c.bf16 %v1586_v40, %v1585_v41 }
 0x43b   :  { %v425_v29 = vmul.f32 %v1611_v28, %v1599_v8  ;;  %v798_v44 = vpop.permute.xlu1 %797  ;;  %1616 = vrcp.f32 %v709_v56 }
 0x43d   :  { %1392 = vmatprep.mubr.msk.f32.mxu1 %vm291_vm5, %v425_v29 }
 0x43e   :  { %v1613_v31 = vpop.eup %1612  ;;  %1393 = vmatmul.mubr.msk.f32.vlgmr.msra.gmra.mrb[6].mxu1 %vm291_vm5, %v426_v30  ;;  %v1579_v32 = vpop.permute.xlu0 %1578  ;;  %v50_v30 = vld [vmem:[#allocation5 + $0x40] sm:$0xff] }
 0x43f   :  { %v1581_v54 = vunpack.i.h.bf16 %v1579_v32  ;;  %v1580_v33 = vunpack.i.l.bf16 %v1579_v32  ;;  %v312_v34 = vmul.f32 %v1613_v31, %v1601_v12  ;;  %v51_v31 = vld [vmem:[#allocation5 + $0x50] sm:$0xff] }
 0x440   :  { %v1508_v32 = vpack.c.bf16 %v51_v31, %v50_v30 }
 0x441   :  { %v1484_v37 = vpack.c.bf16 %v1581_v54, %v1580_v33  ;;  %1399 = vmatprep.mubr.msk.f32.mxu1 %vm291_vm5, %v312_v34  ;;  %v1615_v39 = vpop.eup %1614 }
 0x442   :  { %v313_v42 = vmul.f32 %v1615_v39, %v1603_v14  ;;  %1509 = vmatprep.subr.bf16.mxu0 %v1508_v32 }
 0x443   :  { %1485 = vmatprep.subr.bf16.mxu1 %v1484_v37  ;;  %1511 = vmatpush3.bf16.msra.mxu0 %v1508_v32 }
 0x444   :  { %1487 = vmatpush3.bf16.msra.mxu1 %v1484_v37 }
 0x445   :  { %1495 = vmatprep.subr.bf16.mxu1 %v1819_v58  ;;  %v1617_v46 = vpop.eup %1616 }
 0x446   :  { %v713_v49 = vmul.f32 %v1617_v46, %v1605_v16 }
 0x447   :  { %1400 = vmatmul.mubr.msk.f32.vlgmr.msra.gmra.mrb[6].mxu1 %vm291_vm5, %v313_v42 }
 0x448   :  { %1497 = vmatpush3.bf16.msra.mxu1 %v1819_v58 }
 0x449   :  { %1500 = vmatprep.subr.msk.bf16.mxu1 %vm1831_vm2, %v1498_v43 }
 0x46c   :  { %v706_v45 = vpop.xlane.xlu1 %705 }
 0x46d   :  { %1618 = vrcp.f32 %v706_v45 }
 0x470   :  { %v800_v58 = vpop.permute.xlu1 %799 }
 0x477   :  { %v1619_v47 = vpop.eup %1618 }
 0x478   :  { %v712_v48 = vmul.f32 %v1619_v47, %v1607_v22 }
 0x47a   :  { %1413 = vmatprep.mubr.msk.f32.mxu1 %vm291_vm5, %v712_v48 }
 0x47b   :  { %1414 = vmatmul.mubr.msk.f32.vlgmr.msra.gmra.mrb[6].mxu1 %vm291_vm5, %v713_v49  ;;  %v1041_v49 = vsub.s32 3, %v1788_v36 }
 0x47c   :  { %1503 = vmatpush3.bf16.xpose.msk.msra.mxu1 %vm1831_vm2, %v1498_v43  ;;  %1420 = vmatprep.mubr.msk.f32.mxu1 %vm207_vm1, %v798_v44 }
 0x483   :  { %1421 = vmatmul.mubr.msk.f32.vlgmr.msra.gmra.mrb[8].mxu1 %vm207_vm1, %v800_v58  ;;  %v1047_v58 = vsub.s32 4, %v1788_v36 }
 0x556   :  { %v1422_v50 = vpop.f32.mrb[8].mxu1 }
 0x557   :  { %v885_v51 = vadd.f32 %v1422_v50, %v1855_v20  ;;  %v879_v59 = vpop.f32.mrb[9].mxu1 }
 0x558   :  { %v880_v60 = vadd.f32 %v879_v59, %v1857_v21 }
 0x559   :  { %v891_v61 = vsel %vm291_vm5, %v885_v51, -inf }
 0x55a   :  { %892 = vmax.xlane.f32.xlu1 %v891_v61  ;;  %v888_v62 = vsel %vm291_vm5, %v880_v60, -inf  ;;  %v1048_v61 = vrot.slane %v1791_v38, %v1047_v58 }
 0x55b   :  { %889 = vmax.xlane.f32.xlu0 %v888_v62 }
 0x5e7   :  { %v893_v63 = vpop.xlane.xlu1 %892 }
 0x5e8   :  { %v895_v4 = vsub.f32 %v885_v51, %v893_v63  ;;  %v890_v2 = vpop.xlane.xlu0 %889  ;;  %v1042_v51 = vrot.slane %v1791_v38, %v1041_v49 }
 0x5e9   :  { %v894_v3 = vsub.f32 %v880_v60, %v890_v2 }
 0x5ea   :  { %v898_v5 = vmul.f32 1.442695, %v895_v4 }
 0x5eb   :  { %v896_v6 = vmul.f32 1.442695, %v894_v3 }
 0x5ec   :  { %1620 = vpow2.f32 %v898_v5 }
 0x5ed   :  { %1622 = vpow2.f32 %v896_v6 }
 0x5f6   :  { %v1621_v7 = vpop.eup %1620 }
 0x5f7   :  { %v903_v20 = vsel %vm291_vm5, %v1621_v7, 0.0  ;;  %v1623_v8 = vpop.eup %1622 }
 0x5f8   :  { %904 = vadd.xlane.f32.xlu0 %v903_v20  ;;  %v900_v21 = vsel %vm291_vm5, %v1623_v8, 0.0  ;;  %v55_v20 = vld [vmem:[#allocation5 + $0x90] sm:$0xff] }
 0x5fc   :  { %901 = vadd.xlane.f32.xlu0 %v900_v21  ;;  %v56_v21 = vld [vmem:[#allocation5 + $0xa0] sm:$0xff] }
 0x612   :  { %1588 = vrot.lane.b32.xlu0 %v1587_v57, %s1720_s8 }
 0x685   :  { %v905_v9 = vpop.xlane.xlu0 %904 }
 0x686   :  { %1624 = vrcp.f32 %v905_v9  ;;  %v57_v9 = vld [vmem:[#allocation5 + $0xb0] sm:$0xff] }
 0x689   :  { %v902_v10 = vpop.xlane.xlu0 %901 }
 0x68a   :  { %1626 = vrcp.f32 %v902_v10  ;;  %v1520_v10 = vpack.c.bf16 %v57_v9, %v56_v21 }
 0x68d   :  { %v1589_v11 = vpop.permute.xlu0 %1588 }
 0x68e   :  { %v1591_v12 = vunpack.i.h.bf16 %v1589_v11  ;;  %v1590_v13 = vunpack.i.l.bf16 %v1589_v11  ;;  %v58_v11 = vld [vmem:[#allocation5 + $0xc0] sm:$0xff] }
 0x690   :  { %v1504_v14 = vpack.c.bf16 %v1591_v12, %v1590_v13  ;;  %v1625_v15 = vpop.eup %1624  ;;  %v59_v12 = vld [vmem:[#allocation5 + $0xd0] sm:$0xff] }
 0x691   :  { %v909_v18 = vmul.f32 %v1625_v15, %v1621_v7  ;;  %v54_v7 = vld [vmem:[#allocation5 + $0x80] sm:$0xff]  ;;  %v1524_v13 = vpack.c.bf16 %v59_v12, %v58_v11  ;;  %v61_v15 = vld [vmem:[#allocation5 + $0xf0] sm:$0xff] }
 0x692   :  { %1505 = vmatprep.subr.bf16.mxu1 %v1504_v14 }
 0x693   :  { %1507 = vmatpush3.bf16.msra.mxu1 %v1504_v14  ;;  %v60_v14 = vld [vmem:[#allocation5 + $0xe0] sm:$0xff] }
 0x694   :  { %v1627_v16 = vpop.eup %1626 }
 0x695   :  { %v908_v17 = vmul.f32 %v1627_v16, %v1623_v8  ;;  %v1516_v8 = vpack.c.bf16 %v55_v20, %v54_v7  ;;  %v1528_v16 = vpack.c.bf16 %v61_v15, %v60_v14  ;;  %v1190_v14 = vsub.s32 5, %v1788_v36 }
 0x697   :  { %1427 = vmatprep.mubr.msk.f32.mxu1 %vm291_vm5, %v908_v17  ;;  %v1053_v17 = vsub.s32 6, %v1788_v36  ;;  %v1191_v15 = vrot.slane %v1791_v38, %v1190_v14 }
 0x698   :  { %1428 = vmatmul.mubr.msk.f32.vlgmr.msra.gmra.mrb[6].mxu1 %vm291_vm5, %v909_v18 }
 0x699   :  { %v1054_v18 = vrot.slane %v1791_v38, %v1053_v17 }
 0x76b   :  { %v1429_v57 = vpop.f32.mrb[6].mxu1 }
 0x76c   :  { %v1006_v19 = vadd.f32 %v1429_v57, %v1004_v55  ;;  %v990_v22 = vpop.f32.mrb[7].mxu1 }
 0x76d   :  { %v1005_v23 = vadd.f32 %v1004_v55, %v990_v22 }
 0x76e   :  { %v1008_v24 = vadd.f32 %v1006_v19, %v1773_v0  ;;  %v52_v0 = vld [vmem:[#allocation5 + $0x60] sm:$0xff] }
 0x76f   :  { %v1007_v25 = vadd.f32 %v1005_v23, %v1775_v1  ;;  %v53_v1 = vld [vmem:[#allocation5 + $0x70] sm:$0xff] }
 0x770   :  { %v1012_v26 = vsel %vm75_vm0, %v1008_v24, 0.0  ;;  %v1016_v56 = vmul.f32 %v1008_v24, %v1008_v24  ;;  %v1512_v54 = vpack.c.bf16 %v53_v1, %v52_v0 }
 0x771   :  { %1013 = vadd.xlane.f32.xlu1 %v1012_v26  ;;  %v1009_v27 = vsel %vm75_vm0, %v1007_v25, 0.0  ;;  %v1015_v52 = vmul.f32 %v1007_v25, %v1007_v25 }
 0x772   :  { %v1020_v29 = vsel %vm75_vm0, %v1016_v56, 0.0  ;;  %1513 = vmatprep.subr.bf16.mxu0 %v1512_v54 }
 0x773   :  { %v1017_v28 = vsel %vm75_vm0, %v1015_v52, 0.0  ;;  %1515 = vmatpush3.bf16.msra.mxu0 %v1512_v54 }
 0x774   :  { %1517 = vmatprep.subr.bf16.mxu0 %v1516_v8 }
 0x775   :  { %1010 = vadd.xlane.f32.xlu1 %v1009_v27 }
 0x779   :  { %1018 = vadd.xlane.f32.xlu1 %v1017_v28 }
 0x77d   :  { %1021 = vadd.xlane.f32.xlu1 %v1020_v29 }
 0x7fe   :  { %v1014_v33 = vpop.xlane.xlu1 %1013 }
 0x7ff   :  { %v1024_v39 = vmul.f32 0.03125, %v1014_v33 }
 0x801   :  { %v1028_v44 = vmul.f32 %v1024_v39, %v1024_v39  ;;  %v1032_v62 = vsub.f32 %v1008_v24, %v1024_v39 }
 0x802   :  { %v1011_v34 = vpop.xlane.xlu1 %1010 }
 0x803   :  { %v1023_v35 = vmul.f32 0.03125, %v1011_v34 }
 0x805   :  { %v1027_v40 = vmul.f32 %v1023_v35, %v1023_v35  ;;  %v1031_v50 = vsub.f32 %v1007_v25, %v1023_v35 }
 0x806   :  { %v1019_v37 = vpop.xlane.xlu1 %1018 }
 0x807   :  { %v1025_v41 = vmul.f32 0.03125, %v1019_v37 }
 0x809   :  { %v1029_v42 = vsub.f32 %v1025_v41, %v1027_v40 }
 0x80a   :  { %v1022_v43 = vpop.xlane.xlu1 %1021 }
 0x80b   :  { %v1033_v45 = vadd.f32 1e-05, %v1029_v42  ;;  %v1026_v46 = vmul.f32 0.03125, %v1022_v43 }
 0x80d   :  { %1628 = vrsqrt.f32 %v1033_v45  ;;  %v1030_v47 = vsub.f32 %v1026_v46, %v1028_v44 }
 0x80f   :  { %v1034_v48 = vadd.f32 1e-05, %v1030_v47 }
 0x811   :  { %1630 = vrsqrt.f32 %v1034_v48 }
 0x817   :  { %v1629_v59 = vpop.eup %1628 }
 0x818   :  { %v1037_v60 = vmul.f32 %v1629_v59, %v1031_v50 }
 0x81a   :  { %v1043_v63 = vmul.f32 %v1042_v51, %v1037_v60 }
 0x81b   :  { %v1631_v4 = vpop.eup %1630 }
 0x81c   :  { %v1038_v2 = vmul.f32 %v1631_v4, %v1032_v62  ;;  %v1920_v3 = vadd.f32 %v1048_v61, %v1043_v63  ;;  %v1729_v4 = vmov -1.0  }
 0x81e   :  { %v1044_v5 = vmul.f32 %v1042_v51, %v1038_v2  ;;  %1438 = vmatprep.mubr.msk.f32.mxu0 %vm75_vm0, %v1920_v3 }
 0x820   :  { %v1924_v6 = vadd.f32 %v1048_v61, %v1044_v5 }
 0x822   :  { %1439 = vmatmul.mubr.msk.f32.vlgmr.msra.gmra.mrb[4].mxu0 %vm75_vm0, %v1924_v6 }
 0x823   :  { %1519 = vmatpush3.bf16.msra.mxu0 %v1516_v8 }
 0x824   :  { %1521 = vmatprep.subr.bf16.mxu0 %v1520_v10 }
 0x827   :  { %1523 = vmatpush3.bf16.msra.mxu0 %v1520_v10 }
 0x828   :  { %1525 = vmatprep.subr.bf16.mxu0 %v1524_v13 }
 0x82b   :  { %1527 = vmatpush3.bf16.msra.mxu0 %v1524_v13 }
 0x82c   :  { %1529 = vmatprep.subr.bf16.mxu0 %v1528_v16 }
 0x82f   :  { %1531 = vmatpush3.bf16.msra.mxu0 %v1528_v16 }
 0x8f5   :  { %v1440_v53 = vpop.f32.mrb[4].mxu0 }
 0x8f6   :  { %v1133_v55 = vadd.f32 %v1440_v53, %v1054_v18  ;;  %v1127_v57 = vpop.f32.mrb[5].mxu0 }
 0x8f7   :  { %v1128_v19 = vadd.f32 %v1127_v57, %v1054_v18 }
 0x8f8   :  { %v1137_v22 = vmul.f32 0.70710677, %v1133_v55  ;;  %v1183_v11 = vmul.f32 0.5, %v1133_v55 }
 0x8f9   :  { %v1136_v23 = vmul.f32 0.70710677, %v1128_v19  ;;  %v1182_v9 = vmul.f32 0.5, %v1128_v19 }
 0x8fa   :  { %v1143_v24 = vand.u32 2147483647, %v1137_v22  ;;  %vm1139_vm6 = vcmp.ge.f32.partialorder %v1137_v22, 0.0 }
 0x8fb   :  { %v1142_v25 = vand.u32 2147483647, %v1136_v23  ;;  %vm1138_vm7 = vcmp.ge.f32.partialorder %v1136_v23, 0.0  ;;  %v1141_v2 = vsel %vm1139_vm6, 1.0, %v1729_v4 }
 0x8fc   :  { %v1145_v26 = vmul.f32 0.3275911, %v1143_v24  ;;  %v1169_v56 = vsub.f32 0.0, %v1143_v24  ;;  %v1140_v20 = vsel %vm1138_vm7, 1.0, %v1729_v4 }
 0x8fd   :  { %v1144_v27 = vmul.f32 0.3275911, %v1142_v25  ;;  %v1168_v29 = vsub.f32 0.0, %v1142_v25 }
 0x8fe   :  { %v1147_v52 = vadd.f32 1.0, %v1145_v26  ;;  %v1171_v31 = vmul.f32 %v1169_v56, %v1143_v24 }
 0x8ff   :  { %v1146_v28 = vadd.f32 1.0, %v1144_v27  ;;  %v1170_v1 = vmul.f32 %v1168_v29, %v1142_v25 }
 0x900   :  { %1632 = vrcp.f32 %v1147_v52  ;;  %v1174_v34 = vmul.f32 1.442695, %v1171_v31 }
 0x901   :  { %1634 = vrcp.f32 %v1146_v28  ;;  %v1172_v39 = vmul.f32 1.442695, %v1170_v1 }
 0x902   :  { %1636 = vpow2.f32 %v1174_v34 }
 0x903   :  { %1638 = vpow2.f32 %v1172_v39 }
 0x90a   :  { %v1633_v30 = vpop.eup %1632 }
 0x90b   :  { %v1635_v32 = vpop.eup %1634  ;;  %v1151_v0 = vmul.f32 1.0614054, %v1633_v30 }
 0x90c   :  { %v1150_v54 = vmul.f32 1.0614054, %v1635_v32  ;;  %v1637_v51 = vpop.eup %1636 }
 0x90d   :  { %v1153_v33 = vadd.f32 -1.4531521, %v1151_v0  ;;  %v1639_v60 = vpop.eup %1638 }
 0x90e   :  { %v1152_v35 = vadd.f32 -1.4531521, %v1150_v54 }
 0x90f   :  { %v1155_v37 = vmul.f32 %v1633_v30, %v1153_v33 }
 0x910   :  { %v1154_v40 = vmul.f32 %v1635_v32, %v1152_v35 }
 0x911   :  { %v1157_v41 = vadd.f32 1.4214138, %v1155_v37 }
 0x912   :  { %v1156_v42 = vadd.f32 1.4214138, %v1154_v40 }
 0x913   :  { %v1159_v43 = vmul.f32 %v1633_v30, %v1157_v41 }
 0x914   :  { %v1158_v44 = vmul.f32 %v1635_v32, %v1156_v42 }
 0x915   :  { %v1161_v45 = vadd.f32 -0.28449672, %v1159_v43 }
 0x916   :  { %v1160_v46 = vadd.f32 -0.28449672, %v1158_v44 }
 0x917   :  { %v1163_v47 = vmul.f32 %v1633_v30, %v1161_v45 }
 0x918   :  { %v1162_v48 = vmul.f32 %v1635_v32, %v1160_v46 }
 0x919   :  { %v1165_v49 = vadd.f32 0.2548296, %v1163_v47 }
 0x91a   :  { %v1164_v58 = vadd.f32 0.2548296, %v1162_v48 }
 0x91b   :  { %v1167_v50 = vmul.f32 %v1633_v30, %v1165_v49 }
 0x91c   :  { %v1166_v59 = vmul.f32 %v1635_v32, %v1164_v58 }
 0x91d   :  { %v1177_v61 = vmul.f32 %v1637_v51, %v1167_v50 }
 0x91e   :  { %v1176_v62 = vmul.f32 %v1639_v60, %v1166_v59 }
 0x91f   :  { %v1179_v63 = vsub.f32 1.0, %v1177_v61 }
 0x920   :  { %v1178_v5 = vsub.f32 1.0, %v1176_v62 }
 0x921   :  { %v1181_v7 = vmul.f32 %v1179_v63, %v1141_v2 }
 0x922   :  { %v1180_v8 = vmul.f32 %v1178_v5, %v1140_v20 }
 0x923   :  { %v1185_v21 = vadd.f32 1.0, %v1181_v7 }
 0x924   :  { %v1184_v10 = vadd.f32 1.0, %v1180_v8 }
 0x925   :  { %v1187_v13 = vmul.f32 %v1185_v21, %v1183_v11 }
 0x926   :  { %v1186_v12 = vmul.f32 %v1184_v10, %v1182_v9 }
 0x928   :  { %1457 = vmatprep.mubr.msk.f32.mxu0 %vm1192_vm8, %v1186_v12 }
 0x929   :  { %1458 = vmatmul.mubr.msk.f32.vlgmr.msra.gmra.mrb[6].mxu0 %vm1192_vm8, %v1187_v13 }
 0x9fc   :  { %v1459_v16 = vpop.f32.mrb[6].mxu0 }
 0x9fd   :  { %v1271_v17 = vadd.f32 %v1459_v16, %v1191_v15  ;;  %v1265_v18 = vpop.f32.mrb[7].mxu0 }
 0x9fe   :  { %v1266_v53 = vadd.f32 %v1265_v18, %v1191_v15 }
 0x9ff   :  { %v1275_v57 = vadd.f32 %v1271_v17, %v1924_v6 }
 0xa00   :  { %v1274_v19 = vadd.f32 %v1266_v53, %v1920_v3 }
 0xa01   :  { %1277 = vst.msk [vmem:[#allocation7 + $0x8] sm:$0xff] %vm75_vm0, %v1275_v57 }
 0xa02   :  { %1276 = vst.msk [vmem:[#allocation7] sm:$0xff] %vm75_vm0, %v1274_v19 }
 0xa03   :  { %1695 = shalt.err (!%p1692_p6)
}
 0xa04   :  { %s1696_s23 = scalar_lea.hbm %s1953_s2, 256 }
 0xa05   :  { %p1697_p7 = scmp.ne.s32.totalorder %s1953_s2, %s1696_s23  ;;  %p1700_p8 = scmp.lt.u32.totalorder %s1696_s23, %s1953_s2 }
 0xa07   :  { %p1702_p9 = pnand %p1700_p8, %p1697_p7 }
 0xa09   :  { %1705 = shalt.err (!%p1702_p9)
}
 0xa0a   :  { %1289 = dma.vmem_to_hbm [thread:$0]  %s1284_s17, 256, %s1953_s2, [#allocation4], %s1713_s19, %s1713_s19, %s1714_s20  }
 0xa0b   :  { %1710 = dma.done.wait [#allocation4], 256  }
 0xa0c   :  { %1711 = vsyncadd [#allocation4], 4294967040 }
 0xa0d   :  { %1293 = vsyncpa [#allocation3], 1 }
 0xa0e   :  { %1294 = vsyncpa [#allocation6], 1 }
 0xa0f   :  { %1295 = vsyncpa [#allocation4], 1 }

</bundles_post_ra>
